<compile_context>
chip_gen: v6e
topology: v6e:2x2x1
jax: 0.10.0
libtpu: 0.0.40
codegen_flags: <defaults>
</compile_context>

<pallas_src>
import functools

import jax
import jax.numpy as jnp
from jax.experimental import pallas as pl
from jax.experimental.pallas import tpu as pltpu

_LANE = 128  # lane width: feature dims and batch tiles are rounded to this.


def _round_up(n: int, m: int) -> int:
    return ((n + m - 1) // m) * m


def _pad_to(a, rows: int, cols: int):
    return jnp.pad(a, ((0, rows - a.shape[0]), (0, cols - a.shape[1])))


def _make_encode_kernel(n_main: int):
    """Kernel: plain linear -> n_main x (linear + relu) -> out linear.

    refs layout: [x, w_plain, b_plain, (w_i, b_i) * n_main, w_out, b_out, o]
    Weights are bf16 (MXU operands), biases f32, accumulation f32.
    """

    def kernel(*refs):
        x_ref = refs[0]
        o_ref = refs[-1]
        wp_ref, bp_ref = refs[1], refs[2]

        # front_end 'plain': Linear, no activation.
        h = (
            jnp.dot(x_ref[...], wp_ref[...], preferred_element_type=jnp.float32)
            + bp_ref[...]
        )

        # main: Linear + ReLU per layer.
        base = 3
        for i in range(n_main):
            w_ref = refs[base + 2 * i]
            b_ref = refs[base + 2 * i + 1]
            h = (
                jnp.dot(h.astype(w_ref.dtype), w_ref[...],
                        preferred_element_type=jnp.float32)
                + b_ref[...]
            )
            h = jnp.maximum(h, 0.0)

        # out: Linear, no activation (dropout=False -> identity).
        wo_ref = refs[base + 2 * n_main]
        bo_ref = refs[base + 2 * n_main + 1]
        o_ref[...] = (
            jnp.dot(h.astype(wo_ref.dtype), wo_ref[...],
                    preferred_element_type=jnp.float32)
            + bo_ref[...]
        ).astype(o_ref.dtype)

    return kernel


@functools.partial(jax.jit, static_argnames=("max_tile_n", "compute_dtype"))
def encode_layer_forward(x, plain_w, plain_b, main_params, out_w, out_b,
                         *, max_tile_n: int = 512,
                         compute_dtype=jnp.bfloat16):
    """x: (N, arch[0]) f32; weights pre-transposed to (in, out); biases (out,)/(1,out).

    Returns (N, arch[-1]) f32.
    # TODO(synk): if the deployment batch is truly tiny (N ~ 2-8), stack many
    # independent forward calls along N at the call-site instead of tiling.
    """
    n, _ = x.shape
    layers = [(plain_w, plain_b)] + list(main_params) + [(out_w, out_b)]
    in_dims = [w.shape[0] for w, _ in layers]
    out_dims = [w.shape[1] for w, _ in layers]
    d_out = out_dims[-1]

    # Pad feature dims to lane multiples so matmuls / stores are unmasked.
    in_pad = [_round_up(d, _LANE) for d in in_dims]
    out_pad = [_round_up(d, _LANE) for d in out_dims]

    # Batch tile: multiple of 128, capped at max_tile_n (halve on v7x via kwarg).
    tile_n = min(max_tile_n, _round_up(n, _LANE))
    n_pad = _round_up(n, tile_n)
    grid = (n_pad // tile_n,)

    # Zero-pad: padded input columns hit zero weight rows, padded output columns
    # get zero bias -> padded lanes stay 0 through relu and the whole chain.
    x_p = _pad_to(x, n_pad, in_pad[0]).astype(compute_dtype)
    padded_params = []
    for (w, b), dip, dop in zip(layers, in_pad, out_pad):
        w_p = _pad_to(w, dip, dop).astype(compute_dtype)
        b_p = _pad_to(b.reshape(1, -1), 1, dop).astype(jnp.float32)
        padded_params.append((w_p, b_p))

    args = [x_p]
    for w_p, b_p in padded_params:
        args.extend([w_p, b_p])

    # BlockSpecs: x / out tiled over the batch grid; weights + biases resident
    # (constant block index across grid steps -> no re-DMA).
    in_specs = [pl.BlockSpec((tile_n, in_pad[0]), lambda i: (i, 0))]
    for w_p, b_p in padded_params:
        in_specs.append(pl.BlockSpec(w_p.shape, lambda i: (0, 0)))
        in_specs.append(pl.BlockSpec(b_p.shape, lambda i: (0, 0)))
    out_spec = pl.BlockSpec((tile_n, out_pad[-1]), lambda i: (i, 0))

    # VMEM budget: double-buffered x/o tiles + resident weights + slack.
    bpe = jnp.dtype(compute_dtype).itemsize
    tile_bytes = tile_n * in_pad[0] * bpe + tile_n * out_pad[-1] * 4
    weight_bytes = sum(int(w.size) * bpe + int(b.size) * 4
                       for w, b in padded_params)
    vmem_limit = min(2 * (tile_bytes + weight_bytes) + (8 << 20), 64 << 20)

    flops = 2 * n_pad * sum(i * o for i, o in zip(in_pad, out_pad))
    bytes_accessed = (int(x_p.size) * bpe + weight_bytes
                      + n_pad * out_pad[-1] * 4)

    y_pad = pl.pallas_call(
        _make_encode_kernel(len(main_params)),
        out_shape=jax.ShapeDtypeStruct((n_pad, out_pad[-1]), jnp.float32),
        grid=grid,
        in_specs=in_specs,
        out_specs=out_spec,
        compiler_params=pltpu.CompilerParams(
            dimension_semantics=("parallel",),
            vmem_limit_bytes=int(vmem_limit)),
        cost_estimate=pl.CostEstimate(
            flops=int(flops), transcendentals=0,
            bytes_accessed=int(bytes_accessed)),
    )(*args)

    return y_pad[:n, :d_out]


def _init_linear(key, fan_in, fan_out):
    """PyTorch nn.Linear default init: U(-1/sqrt(fan_in), 1/sqrt(fan_in)).
    Weight pre-transposed to (in, out); bias as (1, out)."""
    kw, kb = jax.random.split(key)
    bound = 1.0 / (fan_in ** 0.5)
    w = jax.random.uniform(kw, (fan_in, fan_out), jnp.float32, -bound, bound)
    b = jax.random.uniform(kb, (1, fan_out), jnp.float32, -bound, bound)
    return w, b


def reference_forward(x, plain_w, plain_b, main_params, out_w, out_b):
    h = x @ plain_w + plain_b
    for w, b in main_params:
        h = jnp.maximum(h @ w + b, 0.0)
    return h @ out_w + out_b


if __name__ == "__main__":
    # architecture = [in_dim, h1, h2, out_dim]  (EncodeLayer(architecture))
    architecture = [16, 32, 32, 8]

    key = jax.random.PRNGKey(0)
    keys = jax.random.split(key, len(architecture) + 2)

    # plain: Linear(arch[0], arch[1])
    plain_w, plain_b = _init_linear(keys[1], architecture[0], architecture[1])
    # main: Linear(arch[i+1], arch[i+2]) for i in range(len(arch) - 3)
    main_params = []
    for i in range(len(architecture) - 3):
        w, b = _init_linear(keys[2 + i], architecture[i + 1], architecture[i + 2])
        main_params.append((w, b))
    # out: Linear(arch[-2], arch[-1])
    out_w, out_b = _init_linear(keys[-2], architecture[-2], architecture[-1])
    main_params = tuple(main_params)

    # --- small batch (module-consistent shapes) ---
    batch = 2
    x = jax.random.normal(keys[0], (batch, architecture[0]), jnp.float32)
    y = encode_layer_forward(x, plain_w, plain_b, main_params, out_w, out_b)
    y = jax.block_until_ready(y)
    y_ref = reference_forward(x, plain_w, plain_b, main_params, out_w, out_b)
    assert y.shape == (batch, architecture[-1])
    assert jnp.allclose(y, y_ref, atol=2e-2, rtol=2e-2), \
        float(jnp.max(jnp.abs(y - y_ref)))

    # --- larger batch exercising the multi-step grid (tile_n=128 -> 3 steps) ---
    batch2 = 300
    x2 = jax.random.normal(keys[-1], (batch2, architecture[0]), jnp.float32)
    y2 = encode_layer_forward(x2, plain_w, plain_b, main_params, out_w, out_b,
                              max_tile_n=128)
    y2 = jax.block_until_ready(y2)
    y2_ref = reference_forward(x2, plain_w, plain_b, main_params, out_w, out_b)
    assert y2.shape == (batch2, architecture[-1])
    assert jnp.allclose(y2, y2_ref, atol=2e-2, rtol=2e-2), \
        float(jnp.max(jnp.abs(y2 - y2_ref)))

    print("KERNEL_OK")
</pallas_src>

<mosaic_0001>
module attributes {stable_mosaic.version = 11 : i64} {
  func.func @kernel(%arg0: i32, %arg1: memref<128x128xbf16, #tpu.memory_space<vmem>>, %arg2: memref<128x128xbf16, #tpu.memory_space<vmem>>, %arg3: memref<1x128xf32, #tpu.memory_space<vmem>>, %arg4: memref<128x128xbf16, #tpu.memory_space<vmem>>, %arg5: memref<1x128xf32, #tpu.memory_space<vmem>>, %arg6: memref<128x128xbf16, #tpu.memory_space<vmem>>, %arg7: memref<1x128xf32, #tpu.memory_space<vmem>>, %arg8: memref<128x128xf32, #tpu.memory_space<vmem>>) attributes {dimension_semantics = [#tpu.dimension_semantics<parallel>], iteration_bounds = array<i64: 1>, scalar_prefetch = 0 : i64, scratch_operands = 0 : i64, tpu.core_type = #tpu.core_type<tc>, window_params = [{transform_indices = @transform_0, window_bounds = array<i64: 128, 128>}, {pipeline_mode = #tpu.pipeline_mode<synchronous>, transform_indices = @transform_1, window_bounds = array<i64: 128, 128>}, {pipeline_mode = #tpu.pipeline_mode<synchronous>, transform_indices = @transform_2, window_bounds = array<i64: 1, 128>}, {pipeline_mode = #tpu.pipeline_mode<synchronous>, transform_indices = @transform_3, window_bounds = array<i64: 128, 128>}, {pipeline_mode = #tpu.pipeline_mode<synchronous>, transform_indices = @transform_4, window_bounds = array<i64: 1, 128>}, {pipeline_mode = #tpu.pipeline_mode<synchronous>, transform_indices = @transform_5, window_bounds = array<i64: 128, 128>}, {pipeline_mode = #tpu.pipeline_mode<synchronous>, transform_indices = @transform_6, window_bounds = array<i64: 1, 128>}, {transform_indices = @transform_7, window_bounds = array<i64: 128, 128>}]} {
    %c0 = arith.constant 0 : index
    %c0_0 = arith.constant 0 : index
    %0 = vector.load %arg1[%c0, %c0_0] : memref<128x128xbf16, #tpu.memory_space<vmem>>, vector<128x128xbf16>
    %c0_1 = arith.constant 0 : index
    %c0_2 = arith.constant 0 : index
    %1 = vector.load %arg2[%c0_1, %c0_2] : memref<128x128xbf16, #tpu.memory_space<vmem>>, vector<128x128xbf16>
    %cst = arith.constant dense<0.000000e+00> : vector<128x128xf32>
    %2 = tpu.matmul %0, %1, %cst {dimension_numbers = #tpu.dot_dimension_numbers<[1], [0], [0], [1], [0, 0, 1, 1], [], []>} : vector<128x128xbf16>, vector<128x128xbf16>, vector<128x128xf32> -> vector<128x128xf32>
    %c0_3 = arith.constant 0 : index
    %c0_4 = arith.constant 0 : index
    %3 = vector.load %arg3[%c0_3, %c0_4] : memref<1x128xf32, #tpu.memory_space<vmem>>, vector<1x128xf32>
    %4 = vector.broadcast %3 : vector<1x128xf32> to vector<128x128xf32>
    %5 = arith.addf %2, %4 : vector<128x128xf32>
    %6 = arith.truncf %5 : vector<128x128xf32> to vector<128x128xbf16>
    %c0_5 = arith.constant 0 : index
    %c0_6 = arith.constant 0 : index
    %7 = vector.load %arg4[%c0_5, %c0_6] : memref<128x128xbf16, #tpu.memory_space<vmem>>, vector<128x128xbf16>
    %cst_7 = arith.constant dense<0.000000e+00> : vector<128x128xf32>
    %8 = tpu.matmul %6, %7, %cst_7 {dimension_numbers = #tpu.dot_dimension_numbers<[1], [0], [0], [1], [0, 0, 1, 1], [], []>} : vector<128x128xbf16>, vector<128x128xbf16>, vector<128x128xf32> -> vector<128x128xf32>
    %c0_8 = arith.constant 0 : index
    %c0_9 = arith.constant 0 : index
    %9 = vector.load %arg5[%c0_8, %c0_9] : memref<1x128xf32, #tpu.memory_space<vmem>>, vector<1x128xf32>
    %10 = vector.broadcast %9 : vector<1x128xf32> to vector<128x128xf32>
    %11 = arith.addf %8, %10 : vector<128x128xf32>
    %cst_10 = arith.constant 0.000000e+00 : f32
    %12 = vector.broadcast %cst_10 : f32 to vector<128x128xf32>
    %13 = arith.maximumf %11, %12 : vector<128x128xf32>
    %14 = arith.truncf %13 : vector<128x128xf32> to vector<128x128xbf16>
    %c0_11 = arith.constant 0 : index
    %c0_12 = arith.constant 0 : index
    %15 = vector.load %arg6[%c0_11, %c0_12] : memref<128x128xbf16, #tpu.memory_space<vmem>>, vector<128x128xbf16>
    %cst_13 = arith.constant dense<0.000000e+00> : vector<128x128xf32>
    %16 = tpu.matmul %14, %15, %cst_13 {dimension_numbers = #tpu.dot_dimension_numbers<[1], [0], [0], [1], [0, 0, 1, 1], [], []>} : vector<128x128xbf16>, vector<128x128xbf16>, vector<128x128xf32> -> vector<128x128xf32>
    %c0_14 = arith.constant 0 : index
    %c0_15 = arith.constant 0 : index
    %17 = vector.load %arg7[%c0_14, %c0_15] : memref<1x128xf32, #tpu.memory_space<vmem>>, vector<1x128xf32>
    %18 = vector.broadcast %17 : vector<1x128xf32> to vector<128x128xf32>
    %19 = arith.addf %16, %18 : vector<128x128xf32>
    %c0_16 = arith.constant 0 : index
    %c0_17 = arith.constant 0 : index
    %20 = vector.load %arg8[%c0_16, %c0_17] : memref<128x128xf32, #tpu.memory_space<vmem>>, vector<128x128xf32>
    tpu.vector_store %arg8[%c0_16, %c0_17], %19 {strides = array<i32>} : memref<128x128xf32, #tpu.memory_space<vmem>>, vector<128x128xf32>,
    return
  }
  func.func @transform_0(%arg0: i32) -> (i32, i32) {
    %c0_i32 = arith.constant 0 : i32
    %c0_i32_0 = arith.constant 0 : i32
    return %arg0, %c0_i32 : i32, i32
  }
  func.func @transform_1(%arg0: i32) -> (i32, i32) {
    %c0_i32 = arith.constant 0 : i32
    %c0_i32_0 = arith.constant 0 : i32
    %c0_i32_1 = arith.constant 0 : i32
    return %c0_i32, %c0_i32_0 : i32, i32
  }
  func.func @transform_2(%arg0: i32) -> (i32, i32) {
    %c0_i32 = arith.constant 0 : i32
    %c0_i32_0 = arith.constant 0 : i32
    %c0_i32_1 = arith.constant 0 : i32
    return %c0_i32, %c0_i32_0 : i32, i32
  }
  func.func @transform_3(%arg0: i32) -> (i32, i32) {
    %c0_i32 = arith.constant 0 : i32
    %c0_i32_0 = arith.constant 0 : i32
    %c0_i32_1 = arith.constant 0 : i32
    return %c0_i32, %c0_i32_0 : i32, i32
  }
  func.func @transform_4(%arg0: i32) -> (i32, i32) {
    %c0_i32 = arith.constant 0 : i32
    %c0_i32_0 = arith.constant 0 : i32
    %c0_i32_1 = arith.constant 0 : i32
    return %c0_i32, %c0_i32_0 : i32, i32
  }
  func.func @transform_5(%arg0: i32) -> (i32, i32) {
    %c0_i32 = arith.constant 0 : i32
    %c0_i32_0 = arith.constant 0 : i32
    %c0_i32_1 = arith.constant 0 : i32
    return %c0_i32, %c0_i32_0 : i32, i32
  }
  func.func @transform_6(%arg0: i32) -> (i32, i32) {
    %c0_i32 = arith.constant 0 : i32
    %c0_i32_0 = arith.constant 0 : i32
    %c0_i32_1 = arith.constant 0 : i32
    return %c0_i32, %c0_i32_0 : i32, i32
  }
  func.func @transform_7(%arg0: i32) -> (i32, i32) {
    %c0_i32 = arith.constant 0 : i32
    %c0_i32_0 = arith.constant 0 : i32
    return %arg0, %c0_i32 : i32, i32
  }
}

</mosaic_0001>

<bundles_post_ra>
// kernel: encode_layer_forward.1
= control target key start
LH: loop header
LB: loop body
LE: loop exit
PB: predicated region body
PF: predicated region fallthrough
CT: control target
= control target key end

     0   :  { %s1067_s1 = inlined_call_operand.vmem [shape: bf16[128,128], index: 1, kind: input, shape index: {}]   ;;  %s1068_s0 = inlined_call_operand.vmem [shape: bf16[128,128], index: 0, kind: input, shape index: {}]   ;;  %s1069_s3 = inlined_call_operand.vmem [shape: bf16[128,128], index: 3, kind: input, shape index: {}]   ;;  %s1070_s5 = inlined_call_operand.vmem [shape: bf16[128,128], index: 5, kind: input, shape index: {}]   ;;  %s1071_s2 = inlined_call_operand.vmem [shape: f32[1,128], index: 2, kind: input, shape index: {}]   ;;  %s1072_s4 = inlined_call_operand.vmem [shape: f32[1,128], index: 4, kind: input, shape index: {}]   ;;  %s1073_s6 = inlined_call_operand.vmem [shape: f32[1,128], index: 6, kind: input, shape index: {}]   ;;  %s1074_s7 = inlined_call_operand.vmem [shape: f32[128,128], index: 7, kind: output, shape index: {}]  }
   0x1   :  { %v842_v0 = vld [vmem:[%s1067_s1 + $0x38] sm:$0xff]   ;;  %v843_v1 = vld [vmem:[%s1067_s1 + $0x30] sm:$0xff]   ;;  %v844_v2 = vld [vmem:[%s1067_s1 + $0x28] sm:$0xff]  }
   0x2   :  { %730 = vmatprep.subr.bf16.mxu0 %v842_v0  ;;  %v845_v3 = vld [vmem:[%s1067_s1 + $0x20] sm:$0xff]   ;;  %v846_v5 = vld [vmem:[%s1067_s1 + $0x18] sm:$0xff]   ;;  %v847_v6 = vld [vmem:[%s1067_s1 + $0x10] sm:$0xff]  }
   0x3   :  { %731 = vmatpush3.bf16.msra.mxu0 %v842_v0  ;;  %v850_v4 = vld [vmem:[%s1068_s0] sm:$0xff]   ;;  %v858_v7 = vld [vmem:[%s1069_s3 + $0x38] sm:$0xff]   ;;  %v859_v8 = vld [vmem:[%s1069_s3 + $0x30] sm:$0xff]  }
   0x4   :  { %732 = vmatprep.subr.bf16.mxu0 %v843_v1  ;;  %746 = vmatprep.mubr.bf16.mxu0 %v850_v4  ;;  %v848_v9 = vld [vmem:[%s1067_s1 + $0x8] sm:$0xff]   ;;  %v849_v11 = vld [vmem:[%s1067_s1] sm:$0xff]   ;;  %v862_v13 = vld [vmem:[%s1069_s3 + $0x18] sm:$0xff]  }
   0x5   :  { %762 = vmatprep.subr.bf16.mxu1 %v858_v7  ;;  %v860_v10 = vld [vmem:[%s1069_s3 + $0x28] sm:$0xff]   ;;  %v861_v12 = vld [vmem:[%s1069_s3 + $0x20] sm:$0xff]   ;;  %v852_v15 = vld [vmem:[%s1068_s0 + $0x10] sm:$0xff]  }
   0x6   :  { %763 = vmatpush3.bf16.msra.mxu1 %v858_v7  ;;  %v851_v14 = vld [vmem:[%s1068_s0 + $0x8] sm:$0xff]   ;;  %v853_v16 = vld [vmem:[%s1068_s0 + $0x18] sm:$0xff]   ;;  %v854_v17 = vld [vmem:[%s1068_s0 + $0x20] sm:$0xff]  }
   0x7   :  { %733 = vmatpush3.bf16.msra.mxu0 %v843_v1  ;;  %764 = vmatprep.subr.bf16.mxu1 %v859_v8  ;;  %v855_v18 = vld [vmem:[%s1068_s0 + $0x28] sm:$0xff]   ;;  %v856_v19 = vld [vmem:[%s1068_s0 + $0x30] sm:$0xff]   ;;  %v857_v20 = vld [vmem:[%s1068_s0 + $0x38] sm:$0xff]  }
   0x8   :  { %734 = vmatprep.subr.bf16.mxu0 %v844_v2  ;;  %v863_v21 = vld [vmem:[%s1069_s3 + $0x10] sm:$0xff]   ;;  %v864_v22 = vld [vmem:[%s1069_s3 + $0x8] sm:$0xff]   ;;  %v865_v23 = vld [vmem:[%s1069_s3] sm:$0xff]  }
   0x9   :  { %v866_v24 = vld [vmem:[%s1070_s5 + $0x38] sm:$0xff]   ;;  %v867_v25 = vld [vmem:[%s1070_s5 + $0x30] sm:$0xff]   ;;  %v868_v26 = vld [vmem:[%s1070_s5 + $0x28] sm:$0xff]  }
   0xa   :  { %765 = vmatpush3.bf16.msra.mxu1 %v859_v8  ;;  %v869_v27 = vld [vmem:[%s1070_s5 + $0x20] sm:$0xff]   ;;  %v870_v28 = vld [vmem:[%s1070_s5 + $0x18] sm:$0xff]   ;;  %v872_v7 = vld [vmem:[%s1070_s5 + $0x8] sm:$0xff]  }
   0xb   :  { %735 = vmatpush3.bf16.msra.mxu0 %v844_v2  ;;  %766 = vmatprep.subr.bf16.mxu1 %v860_v10  ;;  %v647_v32 = vld [vmem:[%s1071_s2] ss:$0 sm:$0xff] }
   0xc   :  { %736 = vmatprep.subr.bf16.mxu0 %v845_v3  ;;  %v873_v8 = vld [vmem:[%s1070_s5] sm:$0xff]  }
   0xe   :  { %767 = vmatpush3.bf16.msra.mxu1 %v860_v10 }
   0xf   :  { %737 = vmatpush3.bf16.msra.mxu0 %v845_v3  ;;  %768 = vmatprep.subr.bf16.mxu1 %v861_v12 }
  0x10   :  { %738 = vmatprep.subr.bf16.mxu0 %v846_v5 }
  0x12   :  { %769 = vmatpush3.bf16.msra.mxu1 %v861_v12 }
  0x13   :  { %739 = vmatpush3.bf16.msra.mxu0 %v846_v5  ;;  %770 = vmatprep.subr.bf16.mxu1 %v862_v13 }
  0x14   :  { %740 = vmatprep.subr.bf16.mxu0 %v847_v6 }
  0x16   :  { %771 = vmatpush3.bf16.msra.mxu1 %v862_v13 }
  0x17   :  { %741 = vmatpush3.bf16.msra.mxu0 %v847_v6  ;;  %772 = vmatprep.subr.bf16.mxu1 %v863_v21  ;;  %v871_v6 = vld [vmem:[%s1070_s5 + $0x10] sm:$0xff]  }
  0x18   :  { %742 = vmatprep.subr.bf16.mxu0 %v848_v9 }
  0x1a   :  { %773 = vmatpush3.bf16.msra.mxu1 %v863_v21 }
  0x1b   :  { %743 = vmatpush3.bf16.msra.mxu0 %v848_v9  ;;  %774 = vmatprep.subr.bf16.mxu1 %v864_v22 }
  0x1c   :  { %744 = vmatprep.subr.bf16.mxu0 %v849_v11 }
  0x1e   :  { %775 = vmatpush3.bf16.msra.mxu1 %v864_v22 }
  0x1f   :  { %745 = vmatpush3.bf16.msra.mxu0 %v849_v11  ;;  %776 = vmatprep.subr.bf16.mxu1 %v865_v23  ;;  %v664_v11 = vld [vmem:[%s1072_s4] ss:$0 sm:$0xff] }
  0x20   :  { %794 = vmatprep.subr.bf16.mxu0 %v866_v24 }
  0x22   :  { %747 = vmatmul.mubr.bf16.vlgmr.msra.gmra.mxu0 %v851_v14  ;;  %777 = vmatpush3.bf16.msra.mxu1 %v865_v23 }
  0x23   :  { %750 = vmatprep.mubr.bf16.mxu0 %v852_v15  ;;  %826 = vmatprep.subr.bf16.mxu1 %v866_v24 }
  0x24   :  { %795 = vmatpush3.bf16.msra.mxu0 %v866_v24 }
  0x25   :  { %796 = vmatprep.subr.bf16.mxu0 %v867_v25 }
  0x28   :  { %797 = vmatpush3.bf16.msra.mxu0 %v867_v25 }
  0x29   :  { %798 = vmatprep.subr.bf16.mxu0 %v868_v26 }
  0x2a   :  { %751 = vmatmul.mubr.bf16.gmra.mxu0 %v853_v16 }
  0x2b   :  { %754 = vmatprep.mubr.bf16.mxu0 %v854_v17 }
  0x2c   :  { %799 = vmatpush3.bf16.msra.mxu0 %v868_v26 }
  0x2d   :  { %800 = vmatprep.subr.bf16.mxu0 %v869_v27 }
  0x30   :  { %801 = vmatpush3.bf16.msra.mxu0 %v869_v27 }
  0x31   :  { %802 = vmatprep.subr.bf16.mxu0 %v870_v28 }
  0x32   :  { %755 = vmatmul.mubr.bf16.gmra.mxu0 %v855_v18 }
  0x33   :  { %758 = vmatprep.mubr.bf16.mxu0 %v856_v19 }
  0x34   :  { %803 = vmatpush3.bf16.msra.mxu0 %v870_v28 }
  0x35   :  { %804 = vmatprep.subr.bf16.mxu0 %v871_v6 }
  0x38   :  { %805 = vmatpush3.bf16.msra.mxu0 %v871_v6 }
  0x39   :  { %806 = vmatprep.subr.bf16.mxu0 %v872_v7 }
  0x3a   :  { %759 = vmatmul.mubr.bf16.gmra.mxu0 %v857_v20 }
  0x3c   :  { %807 = vmatpush3.bf16.msra.mxu0 %v872_v7 }
  0x3d   :  { %808 = vmatprep.subr.bf16.mxu0 %v873_v8 }
  0x40   :  { %809 = vmatpush3.bf16.msra.mxu0 %v873_v8 }
  0xe2   :  { %v748_v29 = vpop.f32.mrf.mxu0 }
  0xe3   :  { %v205_v37 = vadd.f32 %v748_v29, %v647_v32 }
  0xe4   :  { %v196_v30 = vpop.f32.mrf.mxu0 }
  0xe5   :  { %v197_v35 = vadd.f32 %v647_v32, %v196_v30 }
  0xe6   :  { %v749_v31 = vpop.f32.mrf.mxu0 }
  0xe7   :  { %v208_v33 = vadd.f32 %v749_v31, %v647_v32 }
  0xe8   :  { %v199_v34 = vpop.f32.mrf.mxu0 }
  0xe9   :  { %v200_v36 = vadd.f32 %v647_v32, %v199_v34  ;;  %v260_v40 = vpack.c.bf16 %v208_v33, %v205_v37 }
  0xea   :  { %v752_v38 = vpop.f32.mrf.mxu0 }
  0xeb   :  { %v259_v39 = vpack.c.bf16 %v200_v36, %v197_v35  ;;  %v221_v47 = vadd.f32 %v752_v38, %v647_v32 }
  0xec   :  { %v212_v41 = vpop.f32.mrf.mxu0 }
  0xed   :  { %778 = vmatprep.mubr.bf16.mxu1 %v259_v39  ;;  %v213_v45 = vadd.f32 %v647_v32, %v212_v41 }
  0xee   :  { %v753_v42 = vpop.f32.mrf.mxu0  ;;  %779 = vmatmul.mubr.bf16.vlgmr.msra.gmra.mxu1 %v260_v40 }
  0xef   :  { %834 = vmatpush3.bf16.msra.mxu1 %v866_v24  ;;  %v224_v43 = vadd.f32 %v753_v42, %v647_v32 }
  0xf0   :  { %v215_v44 = vpop.f32.mrf.mxu0  ;;  %827 = vmatprep.subr.bf16.mxu1 %v867_v25 }
  0xf1   :  { %v216_v46 = vadd.f32 %v647_v32, %v215_v44  ;;  %v262_v50 = vpack.c.bf16 %v224_v43, %v221_v47 }
  0xf2   :  { %v756_v48 = vpop.f32.mrf.mxu0 }
  0xf3   :  { %v261_v49 = vpack.c.bf16 %v216_v46, %v213_v45  ;;  %835 = vmatpush3.bf16.msra.mxu1 %v867_v25  ;;  %v237_v57 = vadd.f32 %v756_v48, %v647_v32 }
  0xf4   :  { %v228_v51 = vpop.f32.mrf.mxu0  ;;  %828 = vmatprep.subr.bf16.mxu1 %v868_v26 }
  0xf5   :  { %782 = vmatprep.mubr.bf16.mxu1 %v261_v49  ;;  %v229_v55 = vadd.f32 %v647_v32, %v228_v51 }
  0xf6   :  { %v757_v52 = vpop.f32.mrf.mxu0  ;;  %783 = vmatmul.mubr.bf16.gmra.mxu1 %v262_v50 }
  0xf7   :  { %836 = vmatpush3.bf16.msra.mxu1 %v868_v26  ;;  %v240_v53 = vadd.f32 %v757_v52, %v647_v32 }
  0xf8   :  { %v231_v54 = vpop.f32.mrf.mxu0  ;;  %829 = vmatprep.subr.bf16.mxu1 %v869_v27 }
  0xf9   :  { %v232_v56 = vadd.f32 %v647_v32, %v231_v54  ;;  %v264_v60 = vpack.c.bf16 %v240_v53, %v237_v57 }
  0xfa   :  { %v760_v58 = vpop.f32.mrf.mxu0 }
  0xfb   :  { %v263_v59 = vpack.c.bf16 %v232_v56, %v229_v55  ;;  %837 = vmatpush3.bf16.msra.mxu1 %v869_v27  ;;  %v253_v3 = vadd.f32 %v760_v58, %v647_v32 }
  0xfc   :  { %v244_v61 = vpop.f32.mrf.mxu0  ;;  %830 = vmatprep.subr.bf16.mxu1 %v870_v28 }
  0xfd   :  { %786 = vmatprep.mubr.bf16.mxu1 %v263_v59  ;;  %v245_v1 = vadd.f32 %v647_v32, %v244_v61 }
  0xfe   :  { %v761_v62 = vpop.f32.mrf.mxu0  ;;  %787 = vmatmul.mubr.bf16.gmra.mxu1 %v264_v60 }
  0xff   :  { %838 = vmatpush3.bf16.msra.mxu1 %v870_v28  ;;  %v256_v63 = vadd.f32 %v761_v62, %v647_v32 }
 0x100   :  { %v247_v0 = vpop.f32.mrf.mxu0  ;;  %831 = vmatprep.subr.bf16.mxu1 %v871_v6 }
 0x101   :  { %v248_v2 = vadd.f32 %v647_v32, %v247_v0  ;;  %v266_v5 = vpack.c.bf16 %v256_v63, %v253_v3 }
 0x103   :  { %v265_v4 = vpack.c.bf16 %v248_v2, %v245_v1  ;;  %839 = vmatpush3.bf16.msra.mxu1 %v871_v6  ;;  %v673_v2 = vld [vmem:[%s1073_s6] ss:$0 sm:$0xff] }
 0x104   :  { %832 = vmatprep.subr.bf16.mxu1 %v872_v7 }
 0x105   :  { %790 = vmatprep.mubr.bf16.mxu1 %v265_v4 }
 0x106   :  { %791 = vmatmul.mubr.bf16.gmra.mxu1 %v266_v5 }
 0x107   :  { %840 = vmatpush3.bf16.msra.mxu1 %v872_v7 }
 0x108   :  { %833 = vmatprep.subr.bf16.mxu1 %v873_v8 }
 0x10b   :  { %841 = vmatpush3.bf16.msra.mxu1 %v873_v8 }
 0x1ae   :  { %v780_v9 = vpop.f32.mrf.mxu1 }
 0x1af   :  { %v381_v15 = vadd.f32 %v780_v9, %v664_v11 }
 0x1b0   :  { %v372_v10 = vpop.f32.mrf.mxu1 }
 0x1b1   :  { %v373_v13 = vadd.f32 %v664_v11, %v372_v10  ;;  %v437_v22 = vmax.f32 %v381_v15, 0.0 }
 0x1b2   :  { %v781_v12 = vpop.f32.mrf.mxu1 }
 0x1b3   :  { %v384_v14 = vadd.f32 %v781_v12, %v664_v11  ;;  %v435_v20 = vmax.f32 %v373_v13, 0.0 }
 0x1b4   :  { %v375_v16 = vpop.f32.mrf.mxu1 }
 0x1b5   :  { %v376_v17 = vadd.f32 %v664_v11, %v375_v16  ;;  %v438_v18 = vmax.f32 %v384_v14, 0.0 }
 0x1b6   :  { %v784_v19 = vpop.f32.mrf.mxu1 }
 0x1b7   :  { %v436_v21 = vmax.f32 %v376_v17, 0.0  ;;  %v452_v25 = vpack.c.bf16 %v438_v18, %v437_v22  ;;  %v397_v29 = vadd.f32 %v784_v19, %v664_v11 }
 0x1b8   :  { %v388_v23 = vpop.f32.mrf.mxu1 }
 0x1b9   :  { %v451_v24 = vpack.c.bf16 %v436_v21, %v435_v20  ;;  %v389_v27 = vadd.f32 %v664_v11, %v388_v23  ;;  %v441_v36 = vmax.f32 %v397_v29, 0.0 }
 0x1ba   :  { %v785_v26 = vpop.f32.mrf.mxu1 }
 0x1bb   :  { %v400_v28 = vadd.f32 %v785_v26, %v664_v11  ;;  %810 = vmatprep.mubr.bf16.mxu0 %v451_v24  ;;  %v439_v34 = vmax.f32 %v389_v27, 0.0 }
 0x1bc   :  { %v391_v30 = vpop.f32.mrf.mxu1  ;;  %811 = vmatmul.mubr.bf16.vlgmr.msra.gmra.mxu0 %v452_v25 }
 0x1bd   :  { %v392_v31 = vadd.f32 %v664_v11, %v391_v30  ;;  %v442_v32 = vmax.f32 %v400_v28, 0.0 }
 0x1be   :  { %v788_v33 = vpop.f32.mrf.mxu1 }
 0x1bf   :  { %v440_v35 = vmax.f32 %v392_v31, 0.0  ;;  %v454_v39 = vpack.c.bf16 %v442_v32, %v441_v36  ;;  %v413_v43 = vadd.f32 %v788_v33, %v664_v11 }
 0x1c0   :  { %v404_v37 = vpop.f32.mrf.mxu1 }
 0x1c1   :  { %v453_v38 = vpack.c.bf16 %v440_v35, %v439_v34  ;;  %v405_v41 = vadd.f32 %v664_v11, %v404_v37  ;;  %v445_v50 = vmax.f32 %v413_v43, 0.0 }
 0x1c2   :  { %v789_v40 = vpop.f32.mrf.mxu1 }
 0x1c3   :  { %v416_v42 = vadd.f32 %v789_v40, %v664_v11  ;;  %814 = vmatprep.mubr.bf16.mxu0 %v453_v38  ;;  %v443_v48 = vmax.f32 %v405_v41, 0.0 }
 0x1c4   :  { %v407_v44 = vpop.f32.mrf.mxu1  ;;  %815 = vmatmul.mubr.bf16.gmra.mxu0 %v454_v39 }
 0x1c5   :  { %v408_v45 = vadd.f32 %v664_v11, %v407_v44  ;;  %v446_v46 = vmax.f32 %v416_v42, 0.0 }
 0x1c6   :  { %v792_v47 = vpop.f32.mrf.mxu1 }
 0x1c7   :  { %v444_v49 = vmax.f32 %v408_v45, 0.0  ;;  %v456_v53 = vpack.c.bf16 %v446_v46, %v445_v50  ;;  %v429_v57 = vadd.f32 %v792_v47, %v664_v11 }
 0x1c8   :  { %v420_v51 = vpop.f32.mrf.mxu1 }
 0x1c9   :  { %v455_v52 = vpack.c.bf16 %v444_v49, %v443_v48  ;;  %v421_v55 = vadd.f32 %v664_v11, %v420_v51  ;;  %v449_v63 = vmax.f32 %v429_v57, 0.0 }
 0x1ca   :  { %v793_v54 = vpop.f32.mrf.mxu1 }
 0x1cb   :  { %v432_v56 = vadd.f32 %v793_v54, %v664_v11  ;;  %818 = vmatprep.mubr.bf16.mxu1 %v455_v52  ;;  %v447_v61 = vmax.f32 %v421_v55, 0.0 }
 0x1cc   :  { %v423_v58 = vpop.f32.mrf.mxu1  ;;  %819 = vmatmul.mubr.bf16.vlgmr.msra.gmra.mxu1 %v456_v53 }
 0x1cd   :  { %v424_v59 = vadd.f32 %v664_v11, %v423_v58  ;;  %v450_v60 = vmax.f32 %v432_v56, 0.0 }
 0x1cf   :  { %v448_v62 = vmax.f32 %v424_v59, 0.0  ;;  %v458_v1 = vpack.c.bf16 %v450_v60, %v449_v63 }
 0x1d1   :  { %v457_v0 = vpack.c.bf16 %v448_v62, %v447_v61 }
 0x1d3   :  { %822 = vmatprep.mubr.bf16.mxu1 %v457_v0 }
 0x1d4   :  { %823 = vmatmul.mubr.bf16.gmra.mxu1 %v458_v1 }
 0x27c   :  { %v812_v3 = vpop.f32.mrf.mxu0 }
 0x27d   :  { %v573_v4 = vadd.f32 %v812_v3, %v673_v2 }
 0x27e   :  { %v564_v5 = vpop.f32.mrf.mxu0 }
 0x27f   :  { %629 = vst [vmem:[%s1074_s7 + $0x10] sm:$0xff] %v573_v4  ;;  %v565_v6 = vadd.f32 %v673_v2, %v564_v5 }
 0x280   :  { %v813_v7 = vpop.f32.mrf.mxu0 }
 0x281   :  { %627 = vst [vmem:[%s1074_s7] sm:$0xff] %v565_v6  ;;  %v576_v8 = vadd.f32 %v813_v7, %v673_v2 }
 0x282   :  { %v567_v9 = vpop.f32.mrf.mxu0 }
 0x283   :  { %630 = vst [vmem:[%s1074_s7 + $0x18] sm:$0xff] %v576_v8  ;;  %v568_v10 = vadd.f32 %v673_v2, %v567_v9 }
 0x284   :  { %v816_v11 = vpop.f32.mrf.mxu0 }
 0x285   :  { %628 = vst [vmem:[%s1074_s7 + $0x8] sm:$0xff] %v568_v10  ;;  %v589_v12 = vadd.f32 %v816_v11, %v673_v2 }
 0x286   :  { %v580_v13 = vpop.f32.mrf.mxu0 }
 0x287   :  { %633 = vst [vmem:[%s1074_s7 + $0x30] sm:$0xff] %v589_v12  ;;  %v581_v14 = vadd.f32 %v673_v2, %v580_v13 }
 0x288   :  { %v817_v15 = vpop.f32.mrf.mxu0 }
 0x289   :  { %631 = vst [vmem:[%s1074_s7 + $0x20] sm:$0xff] %v581_v14  ;;  %v592_v16 = vadd.f32 %v817_v15, %v673_v2 }
 0x28a   :  { %v583_v17 = vpop.f32.mrf.mxu0 }
 0x28b   :  { %634 = vst [vmem:[%s1074_s7 + $0x38] sm:$0xff] %v592_v16  ;;  %v584_v18 = vadd.f32 %v673_v2, %v583_v17 }
 0x28c   :  { %v820_v19 = vpop.f32.mrf.mxu1 }
 0x28d   :  { %632 = vst [vmem:[%s1074_s7 + $0x28] sm:$0xff] %v584_v18  ;;  %v605_v20 = vadd.f32 %v820_v19, %v673_v2 }
 0x28e   :  { %v596_v21 = vpop.f32.mrf.mxu1 }
 0x28f   :  { %637 = vst [vmem:[%s1074_s7 + $0x50] sm:$0xff] %v605_v20  ;;  %v597_v22 = vadd.f32 %v673_v2, %v596_v21 }
 0x290   :  { %v821_v23 = vpop.f32.mrf.mxu1 }
 0x291   :  { %635 = vst [vmem:[%s1074_s7 + $0x40] sm:$0xff] %v597_v22  ;;  %v608_v24 = vadd.f32 %v821_v23, %v673_v2 }
 0x292   :  { %v599_v25 = vpop.f32.mrf.mxu1 }
 0x293   :  { %638 = vst [vmem:[%s1074_s7 + $0x58] sm:$0xff] %v608_v24  ;;  %v600_v26 = vadd.f32 %v673_v2, %v599_v25 }
 0x294   :  { %v824_v27 = vpop.f32.mrf.mxu1 }
 0x295   :  { %636 = vst [vmem:[%s1074_s7 + $0x48] sm:$0xff] %v600_v26  ;;  %v621_v28 = vadd.f32 %v824_v27, %v673_v2 }
 0x296   :  { %v612_v29 = vpop.f32.mrf.mxu1 }
 0x297   :  { %641 = vst [vmem:[%s1074_s7 + $0x70] sm:$0xff] %v621_v28  ;;  %v613_v30 = vadd.f32 %v673_v2, %v612_v29 }
 0x298   :  { %v825_v31 = vpop.f32.mrf.mxu1 }
 0x299   :  { %639 = vst [vmem:[%s1074_s7 + $0x60] sm:$0xff] %v613_v30  ;;  %v624_v32 = vadd.f32 %v825_v31, %v673_v2 }
 0x29a   :  { %v615_v33 = vpop.f32.mrf.mxu1 }
 0x29b   :  { %642 = vst [vmem:[%s1074_s7 + $0x78] sm:$0xff] %v624_v32  ;;  %v616_v34 = vadd.f32 %v673_v2, %v615_v33 }
 0x29d   :  { %640 = vst [vmem:[%s1074_s7 + $0x68] sm:$0xff] %v616_v34 }

</bundles_post_ra>
